<compile_context>
chip_gen: v6e
topology: v6e:2x2x1
jax: 0.10.0
libtpu: 0.0.40
codegen_flags: <defaults>
</compile_context>

<pallas_src>
import functools

import jax
import jax.numpy as jnp
from jax import lax
from jax.experimental import pallas as pl
from jax.experimental.pallas import tpu as pltpu


def _layernorm(v, g, b, eps=1e-5):
    mu = jnp.mean(v, axis=-1, keepdims=True)
    var = jnp.mean(jnp.square(v - mu), axis=-1, keepdims=True)
    return (v - mu) * lax.rsqrt(var + eps) * g + b


def block_kernel(x_ref, qkv_w_ref, proj_w_ref, fc1_w_ref, fc2_w_ref, small_ref,
                 o_ref, *, num_heads, kv_block, compute_dtype, causal,
                 gelu_approximate):
    n, c = x_ref.shape                       # one sequence: (N, C)
    hd = c // num_heads
    hdim = fc1_w_ref.shape[1]
    cdt = compute_dtype
    exact = jnp.dtype(cdt) == jnp.dtype(jnp.float32)
    n_kv = n // kv_block

    # packed small params: rows = [ln1_g, ln1_b, ln2_g, ln2_b, proj_b, fc2_b, fc1_b]
    ln1_g = small_ref[0:1, :c]
    ln1_b = small_ref[1:2, :c]
    ln2_g = small_ref[2:3, :c]
    ln2_b = small_ref[3:4, :c]
    proj_b = small_ref[4:5, :c]
    fc2_b = small_ref[5:6, :c]
    fc1_b = small_ref[6:7, :hdim]

    def mm(a_f32, w, bias=None):
        out = jnp.dot(a_f32.astype(cdt), w, preferred_element_type=jnp.float32)
        return out if bias is None else out + bias

    x = x_ref[...]                                        # (N, C) f32 slab

    # ---------------- attention branch ----------------
    h1 = _layernorm(x, ln1_g, ln1_b)
    # qkv projection; the 1/sqrt(hd) score scale was folded into the q columns of
    # qkv_w by the wrapper.  Cast to the compute dtype ONCE (halves the footprint
    # of the largest live activation); all matmuls still accumulate in f32.
    qkv = mm(h1, qkv_w_ref[...]).astype(cdt)              # (N, 3C)

    # causal mask built in-kernel (iota compare) -> no (N, N) operand / DMA.
    if causal:
        tile_masks = []
        for t in range(n_kv):
            rows = lax.broadcasted_iota(jnp.int32, (n, kv_block), 0)
            cols = lax.broadcasted_iota(jnp.int32, (n, kv_block), 1) + t * kv_block
            tile_masks.append(
                jnp.where(rows >= cols, 0.0, -1e9).astype(jnp.float32))

    # Per-head attention with lane-dense 2-D slices.  Head outputs feed the
    # output projection directly through per-head (hd, C) slabs of proj_w:
    # no concatenate, no scratch accumulator, no masked scatter stores.
    # Online softmax over kv tiles keeps only (N, kv_block) logits live.
    attn_out = jnp.zeros((n, c), jnp.float32)
    for h in range(num_heads):
        q_h = qkv[:, h * hd:(h + 1) * hd]                 # (N, hd)
        k_h = qkv[:, c + h * hd: c + (h + 1) * hd]
        v_h = qkv[:, 2 * c + h * hd: 2 * c + (h + 1) * hd]

        m_i = jnp.full((n, 1), -1e30, jnp.float32)
        l_i = jnp.zeros((n, 1), jnp.float32)
        acc = jnp.zeros((n, hd), jnp.float32)
        for t in range(n_kv):
            k_t = k_h[t * kv_block:(t + 1) * kv_block, :]
            v_t = v_h[t * kv_block:(t + 1) * kv_block, :]
            # contraction on the last (lane) dim of both operands -> no explicit k.T
            s = lax.dot_general(q_h, k_t, (((1,), (1,)), ((), ())),
                                preferred_element_type=jnp.float32)
            if causal:
                s = s + tile_masks[t]
            m_new = jnp.maximum(m_i, jnp.max(s, axis=-1, keepdims=True))
            alpha = jnp.exp(m_i - m_new)
            p = jnp.exp(s - m_new)
            l_i = alpha * l_i + jnp.sum(p, axis=-1, keepdims=True)
            acc = alpha * acc + jnp.dot(p.astype(cdt), v_t,
                                        preferred_element_type=jnp.float32)
            m_i = m_new

        # approx reciprocal (EUP slot) only on the bf16 path; exact divide for f32
        inv_l = (1.0 / l_i) if exact else pl.reciprocal(l_i, approx=True)
        o_h = (acc * inv_l).astype(cdt)                   # (N, hd)
        attn_out = attn_out + jnp.dot(
            o_h, proj_w_ref[h * hd:(h + 1) * hd, :],
            preferred_element_type=jnp.float32)

    x = x + attn_out + proj_b                             # residual 1

    # ---------------- MLP branch ----------------
    # (dropout layers have p=0.0 in this config -> identity)
    h2 = _layernorm(x, ln2_g, ln2_b)
    hid = mm(h2, fc1_w_ref[...], fc1_b)                   # (N, H) f32
    hid = jax.nn.gelu(hid, approximate=gelu_approximate)
    x = x + mm(hid, fc2_w_ref[...], fc2_b)                # residual 2

    o_ref[...] = x.astype(o_ref.dtype)


def _pick_kv_block(n, target=512):
    if n <= target:
        return n
    for t in range(target, 0, -1):
        if n % t == 0:
            return t
    return n


def _vmem_limit_bytes():
    # Per-generation VMEM budget: ~3/4 of physical (=> ~96 MiB on v5e/v6e's
    # 128 MiB, ~48 MiB on v7x's 64 MiB), leaving headroom for compiler scratch.
    try:
        cap = int(pltpu.get_tpu_info().vmem_capacity_bytes)
    except Exception:
        cap = 64 * 1024 * 1024
    return (cap * 3) // 4


def transformer_block(x, params, *, num_heads, causal=True,
                      compute_dtype=jnp.bfloat16, kv_block=None,
                      gelu_approximate=False):
    B, N, C = x.shape
    H = params["fc1_w"].shape[1]
    assert C % num_heads == 0, "C must be divisible by num_heads"
    hd = C // num_heads
    cdt = compute_dtype

    if kv_block is None:
        kv_block = _pick_kv_block(N)
    assert N % kv_block == 0

    # Weights cast once outside the kernel (bf16 halves per-step DMA bytes).
    # The attention score scale is folded into the q columns of the qkv weight.
    qkv_w = params["qkv_w"].astype(jnp.float32)
    qkv_w = qkv_w.at[:, :C].multiply(hd ** (-0.5)).astype(cdt)
    proj_w = params["proj_w"].astype(cdt)
    fc1_w = params["fc1_w"].astype(cdt)
    fc2_w = params["fc2_w"].astype(cdt)

    # Pack the seven tiny per-channel vectors into one f32 tensor (one DMA).
    PAD = max(C, H)
    small = jnp.zeros((7, PAD), jnp.float32)
    small = small.at[0, :C].set(params["ln1_g"].reshape(-1))
    small = small.at[1, :C].set(params["ln1_b"].reshape(-1))
    small = small.at[2, :C].set(params["ln2_g"].reshape(-1))
    small = small.at[3, :C].set(params["ln2_b"].reshape(-1))
    small = small.at[4, :C].set(params["proj_b"].reshape(-1))
    small = small.at[5, :C].set(params["fc2_b"].reshape(-1))
    small = small.at[6, :H].set(params["fc1_b"].reshape(-1))

    # One sequence per grid step: lane/sublane-dense (N, C) slab; grid = B >= 2
    # keeps both v7x TensorCores busy via the "parallel" axis.
    x2 = x.reshape(B * N, C)

    kernel = functools.partial(
        block_kernel, num_heads=num_heads, kv_block=kv_block,
        compute_dtype=cdt, causal=causal, gelu_approximate=gelu_approximate)

    out2 = pl.pallas_call(
        kernel,
        out_shape=jax.ShapeDtypeStruct((B * N, C), x.dtype),
        grid_spec=pltpu.PrefetchScalarGridSpec(
            num_scalar_prefetch=0,
            grid=(B,),
            in_specs=[
                pl.BlockSpec((N, C), lambda i: (i, 0)),        # x rows
                pl.BlockSpec((C, 3 * C), lambda i: (0, 0)),    # qkv weight
                pl.BlockSpec((C, C), lambda i: (0, 0)),        # proj weight
                pl.BlockSpec((C, H), lambda i: (0, 0)),        # fc1 weight
                pl.BlockSpec((H, C), lambda i: (0, 0)),        # fc2 weight
                pl.BlockSpec((7, PAD), lambda i: (0, 0)),      # packed LN/bias
            ],
            out_specs=pl.BlockSpec((N, C), lambda i: (i, 0)),
        ),
        compiler_params=pltpu.CompilerParams(
            dimension_semantics=("parallel",),
            vmem_limit_bytes=_vmem_limit_bytes()),
    )(x2, qkv_w, proj_w, fc1_w, fc2_w, small)

    return out2.reshape(B, N, C)


def reference_block(x, causal_mask, params, *, num_heads):
    """Pure-JAX f32 reference mirroring the PyTorch module (dropout p=0)."""
    B, N, C = x.shape
    hd = C // num_heads
    scale = hd ** (-0.5)

    def ln(v, g, b):
        mu = v.mean(-1, keepdims=True)
        var = ((v - mu) ** 2).mean(-1, keepdims=True)
        return (v - mu) / jnp.sqrt(var + 1e-5) * g + b

    h = ln(x, params["ln1_g"], params["ln1_b"])
    qkv = h @ params["qkv_w"]
    qkv = qkv.reshape(B, N, 3, num_heads, hd).transpose(2, 0, 3, 1, 4)
    q, k, v = qkv[0], qkv[1], qkv[2]
    attn = jnp.einsum("bhqd,bhkd->bhqk", q, k) * scale + causal_mask
    attn = jax.nn.softmax(attn, axis=-1)
    o = jnp.einsum("bhqk,bhkd->bhqd", attn, v).transpose(0, 2, 1, 3).reshape(B, N, C)
    o = o @ params["proj_w"] + params["proj_b"]
    x = x + o
    h2 = ln(x, params["ln2_g"], params["ln2_b"])
    m = jax.nn.gelu(h2 @ params["fc1_w"] + params["fc1_b"], approximate=False)
    m = m @ params["fc2_w"] + params["fc2_b"]
    return x + m


if __name__ == "__main__":
    B, N, C = 2, 8, 32
    num_heads = 4
    mlp_ratio = 4.0
    H = int(C * mlp_ratio)

    key = jax.random.PRNGKey(0)
    keys = jax.random.split(key, 8)
    params = {
        "qkv_w": 0.05 * jax.random.normal(keys[0], (C, 3 * C), jnp.float32),
        "proj_w": 0.05 * jax.random.normal(keys[1], (C, C), jnp.float32),
        "proj_b": 0.01 * jax.random.normal(keys[2], (1, C), jnp.float32),
        "fc1_w": 0.05 * jax.random.normal(keys[3], (C, H), jnp.float32),
        "fc1_b": 0.01 * jax.random.normal(keys[4], (1, H), jnp.float32),
        "fc2_w": 0.05 * jax.random.normal(keys[5], (H, C), jnp.float32),
        "fc2_b": 0.01 * jax.random.normal(keys[6], (1, C), jnp.float32),
        "ln1_g": jnp.ones((1, C), jnp.float32),
        "ln1_b": jnp.zeros((1, C), jnp.float32),
        "ln2_g": jnp.ones((1, C), jnp.float32),
        "ln2_b": jnp.zeros((1, C), jnp.float32),
    }

    x = jax.random.normal(keys[7], (B, N, C), jnp.float32)
    # additive causal mask (0 on/below diagonal, -1e9 above) — only used by the
    # reference; the Pallas kernel builds the same mask in-kernel via iota.
    causal_mask = jnp.where(
        jnp.arange(N)[:, None] >= jnp.arange(N)[None, :], 0.0, -1e9
    ).astype(jnp.float32)

    ref = reference_block(x, causal_mask, params, num_heads=num_heads)

    # bf16 MXU path (tanh GELU on the EUP); grid = B = 2 parallel steps.
    out_bf16 = transformer_block(x, params, num_heads=num_heads,
                                 gelu_approximate=True)
    out_bf16 = jax.block_until_ready(out_bf16)
    assert jnp.allclose(out_bf16, ref, atol=5e-2, rtol=5e-2), \
        "bf16 kernel mismatch vs reference"

    # exact f32 path (exact reciprocal, erf GELU).
    out_f32 = transformer_block(x, params, num_heads=num_heads,
                                compute_dtype=jnp.float32,
                                gelu_approximate=False)
    out_f32 = jax.block_until_ready(out_f32)
    assert jnp.allclose(out_f32, ref, atol=5e-3, rtol=5e-3), \
        "f32 kernel mismatch vs reference"

    print("KERNEL_OK")
</pallas_src>

<mosaic_0001>
module attributes {stable_mosaic.version = 11 : i64} {
  func.func @block_kernel(%arg0: i32, %arg1: memref<8x32xf32, #tpu.memory_space<vmem>>, %arg2: memref<32x96xbf16, #tpu.memory_space<vmem>>, %arg3: memref<32x32xbf16, #tpu.memory_space<vmem>>, %arg4: memref<32x128xbf16, #tpu.memory_space<vmem>>, %arg5: memref<128x32xbf16, #tpu.memory_space<vmem>>, %arg6: memref<7x128xf32, #tpu.memory_space<vmem>>, %arg7: memref<8x32xf32, #tpu.memory_space<vmem>>) attributes {dimension_semantics = [#tpu.dimension_semantics<parallel>], iteration_bounds = array<i64: 2>, scalar_prefetch = 0 : i64, scratch_operands = 0 : i64, tpu.core_type = #tpu.core_type<tc>, window_params = [{transform_indices = @transform_0, window_bounds = array<i64: 8, 32>}, {pipeline_mode = #tpu.pipeline_mode<synchronous>, transform_indices = @transform_1, window_bounds = array<i64: 32, 96>}, {pipeline_mode = #tpu.pipeline_mode<synchronous>, transform_indices = @transform_2, window_bounds = array<i64: 32, 32>}, {pipeline_mode = #tpu.pipeline_mode<synchronous>, transform_indices = @transform_3, window_bounds = array<i64: 32, 128>}, {pipeline_mode = #tpu.pipeline_mode<synchronous>, transform_indices = @transform_4, window_bounds = array<i64: 128, 32>}, {pipeline_mode = #tpu.pipeline_mode<synchronous>, transform_indices = @transform_5, window_bounds = array<i64: 7, 128>}, {transform_indices = @transform_6, window_bounds = array<i64: 8, 32>}]} {
    %c0 = arith.constant 0 : index
    %c0_0 = arith.constant 0 : index
    %0 = vector.load %arg6[%c0, %c0_0] : memref<7x128xf32, #tpu.memory_space<vmem>>, vector<1x32xf32>
    %c1 = arith.constant 1 : index
    %c0_1 = arith.constant 0 : index
    %1 = vector.load %arg6[%c1, %c0_1] : memref<7x128xf32, #tpu.memory_space<vmem>>, vector<1x32xf32>
    %c2 = arith.constant 2 : index
    %c0_2 = arith.constant 0 : index
    %2 = vector.load %arg6[%c2, %c0_2] : memref<7x128xf32, #tpu.memory_space<vmem>>, vector<1x32xf32>
    %c3 = arith.constant 3 : index
    %c0_3 = arith.constant 0 : index
    %3 = vector.load %arg6[%c3, %c0_3] : memref<7x128xf32, #tpu.memory_space<vmem>>, vector<1x32xf32>
    %c4 = arith.constant 4 : index
    %c0_4 = arith.constant 0 : index
    %4 = vector.load %arg6[%c4, %c0_4] : memref<7x128xf32, #tpu.memory_space<vmem>>, vector<1x32xf32>
    %c5 = arith.constant 5 : index
    %c0_5 = arith.constant 0 : index
    %5 = vector.load %arg6[%c5, %c0_5] : memref<7x128xf32, #tpu.memory_space<vmem>>, vector<1x32xf32>
    %c6 = arith.constant 6 : index
    %c0_6 = arith.constant 0 : index
    %6 = vector.load %arg6[%c6, %c0_6] : memref<7x128xf32, #tpu.memory_space<vmem>>, vector<1x128xf32>
    %c0_7 = arith.constant 0 : index
    %c0_8 = arith.constant 0 : index
    %7 = vector.load %arg1[%c0_7, %c0_8] : memref<8x32xf32, #tpu.memory_space<vmem>>, vector<8x32xf32>
    %cst = arith.constant dense<0.000000e+00> : vector<8xf32>
    %8 = vector.multi_reduction <add>, %7, %cst [1] : vector<8x32xf32> to vector<8xf32>
    %9 = vector.shape_cast %8 : vector<8xf32> to vector<8x1xf32>
    %cst_9 = arith.constant 3.200000e+01 : f32
    %10 = vector.broadcast %cst_9 : f32 to vector<8x1xf32>
    %11 = arith.divf %9, %10 : vector<8x1xf32>
    %12 = vector.broadcast %11 : vector<8x1xf32> to vector<8x32xf32>
    %13 = arith.subf %7, %12 : vector<8x32xf32>
    %14 = arith.mulf %13, %13 : vector<8x32xf32>
    %cst_10 = arith.constant dense<0.000000e+00> : vector<8xf32>
    %15 = vector.multi_reduction <add>, %14, %cst_10 [1] : vector<8x32xf32> to vector<8xf32>
    %16 = vector.shape_cast %15 : vector<8xf32> to vector<8x1xf32>
    %cst_11 = arith.constant 3.200000e+01 : f32
    %17 = vector.broadcast %cst_11 : f32 to vector<8x1xf32>
    %18 = arith.divf %16, %17 : vector<8x1xf32>
    %19 = vector.broadcast %11 : vector<8x1xf32> to vector<8x32xf32>
    %20 = arith.subf %7, %19 : vector<8x32xf32>
    %cst_12 = arith.constant 9.99999974E-6 : f32
    %21 = vector.broadcast %cst_12 : f32 to vector<8x1xf32>
    %22 = arith.addf %18, %21 : vector<8x1xf32>
    %23 = math.rsqrt %22 : vector<8x1xf32>
    %24 = vector.broadcast %23 : vector<8x1xf32> to vector<8x32xf32>
    %25 = arith.mulf %20, %24 : vector<8x32xf32>
    %26 = vector.broadcast %0 : vector<1x32xf32> to vector<8x32xf32>
    %27 = arith.mulf %25, %26 : vector<8x32xf32>
    %28 = vector.broadcast %1 : vector<1x32xf32> to vector<8x32xf32>
    %29 = arith.addf %27, %28 : vector<8x32xf32>
    %c0_13 = arith.constant 0 : index
    %c0_14 = arith.constant 0 : index
    %30 = vector.load %arg2[%c0_13, %c0_14] : memref<32x96xbf16, #tpu.memory_space<vmem>>, vector<32x96xbf16>
    %31 = arith.truncf %29 : vector<8x32xf32> to vector<8x32xbf16>
    %cst_15 = arith.constant dense<0.000000e+00> : vector<8x96xf32>
    %32 = tpu.matmul %31, %30, %cst_15 {dimension_numbers = #tpu.dot_dimension_numbers<[1], [0], [0], [1], [0, 0, 1, 1], [], []>} : vector<8x32xbf16>, vector<32x96xbf16>, vector<8x96xf32> -> vector<8x96xf32>
    %33 = arith.truncf %32 : vector<8x96xf32> to vector<8x96xbf16>
    %34 = tpu.iota {dimensions = array<i32: 0>} : vector<8x8xi32>
    %35 = tpu.iota {dimensions = array<i32: 1>} : vector<8x8xi32>
    %c0_i32 = arith.constant 0 : i32
    %36 = vector.broadcast %c0_i32 : i32 to vector<8x8xi32>
    %37 = arith.addi %35, %36 : vector<8x8xi32>
    %38 = arith.cmpi sge, %34, %37 : vector<8x8xi32>
    %cst_16 = arith.constant 0.000000e+00 : f32
    %cst_17 = arith.constant -1.000000e+09 : f32
    %39 = vector.broadcast %cst_16 : f32 to vector<8x8xf32>
    %40 = vector.broadcast %cst_17 : f32 to vector<8x8xf32>
    %41 = arith.select %38, %39, %40 : vector<8x8xi1>, vector<8x8xf32>
    %cst_18 = arith.constant 0.000000e+00 : f32
    %42 = vector.broadcast %cst_18 : f32 to vector<8x32xf32>
    %43 = vector.extract_strided_slice %33 {offsets = [0, 0], sizes = [8, 8], strides = [1, 1]} : vector<8x96xbf16> to vector<8x8xbf16>
    %44 = vector.extract_strided_slice %33 {offsets = [0, 32], sizes = [8, 8], strides = [1, 1]} : vector<8x96xbf16> to vector<8x8xbf16>
    %45 = vector.extract_strided_slice %33 {offsets = [0, 64], sizes = [8, 8], strides = [1, 1]} : vector<8x96xbf16> to vector<8x8xbf16>
    %cst_19 = arith.constant -1.000000e+30 : f32
    %46 = vector.broadcast %cst_19 : f32 to vector<8x1xf32>
    %cst_20 = arith.constant 0.000000e+00 : f32
    %47 = vector.broadcast %cst_20 : f32 to vector<8x1xf32>
    %cst_21 = arith.constant 0.000000e+00 : f32
    %48 = vector.broadcast %cst_21 : f32 to vector<8x8xf32>
    %cst_22 = arith.constant dense<0.000000e+00> : vector<8x8xf32>
    %49 = tpu.matmul %43, %44, %cst_22 {dimension_numbers = #tpu.dot_dimension_numbers<[1], [1], [0], [0], [0, 0, 1, 0], [], []>} : vector<8x8xbf16>, vector<8x8xbf16>, vector<8x8xf32> -> vector<8x8xf32>
    %50 = arith.addf %49, %41 : vector<8x8xf32>
    %cst_23 = arith.constant dense<0xFF800000> : vector<8xf32>
    %51 = vector.multi_reduction <maximumf>, %50, %cst_23 [1] : vector<8x8xf32> to vector<8xf32>
    %52 = vector.shape_cast %51 : vector<8xf32> to vector<8x1xf32>
    %53 = arith.maximumf %46, %52 : vector<8x1xf32>
    %54 = arith.subf %46, %53 : vector<8x1xf32>
    %55 = math.exp %54 : vector<8x1xf32>
    %56 = vector.broadcast %53 : vector<8x1xf32> to vector<8x8xf32>
    %57 = arith.subf %50, %56 : vector<8x8xf32>
    %58 = math.exp %57 : vector<8x8xf32>
    %59 = arith.mulf %55, %47 : vector<8x1xf32>
    %cst_24 = arith.constant dense<0.000000e+00> : vector<8xf32>
    %60 = vector.multi_reduction <add>, %58, %cst_24 [1] : vector<8x8xf32> to vector<8xf32>
    %61 = vector.shape_cast %60 : vector<8xf32> to vector<8x1xf32>
    %62 = arith.addf %59, %61 : vector<8x1xf32>
    %63 = vector.broadcast %55 : vector<8x1xf32> to vector<8x8xf32>
    %64 = arith.mulf %63, %48 : vector<8x8xf32>
    %65 = arith.truncf %58 : vector<8x8xf32> to vector<8x8xbf16>
    %cst_25 = arith.constant dense<0.000000e+00> : vector<8x8xf32>
    %66 = tpu.matmul %65, %45, %cst_25 {dimension_numbers = #tpu.dot_dimension_numbers<[1], [0], [0], [1], [0, 0, 1, 1], [], []>} : vector<8x8xbf16>, vector<8x8xbf16>, vector<8x8xf32> -> vector<8x8xf32>
    %67 = arith.addf %64, %66 : vector<8x8xf32>
    %68 = tpu.reciprocal %62 {approx = true} : vector<8x1xf32> -> vector<8x1xf32>
    %69 = vector.broadcast %68 : vector<8x1xf32> to vector<8x8xf32>
    %70 = arith.mulf %67, %69 : vector<8x8xf32>
    %71 = arith.truncf %70 : vector<8x8xf32> to vector<8x8xbf16>
    %c0_26 = arith.constant 0 : index
    %c0_27 = arith.constant 0 : index
    %72 = vector.load %arg3[%c0_26, %c0_27] : memref<32x32xbf16, #tpu.memory_space<vmem>>, vector<8x32xbf16>
    %cst_28 = arith.constant dense<0.000000e+00> : vector<8x32xf32>
    %73 = tpu.matmul %71, %72, %cst_28 {dimension_numbers = #tpu.dot_dimension_numbers<[1], [0], [0], [1], [0, 0, 1, 1], [], []>} : vector<8x8xbf16>, vector<8x32xbf16>, vector<8x32xf32> -> vector<8x32xf32>
    %74 = arith.addf %42, %73 : vector<8x32xf32>
    %75 = vector.extract_strided_slice %33 {offsets = [0, 8], sizes = [8, 8], strides = [1, 1]} : vector<8x96xbf16> to vector<8x8xbf16>
    %76 = vector.extract_strided_slice %33 {offsets = [0, 40], sizes = [8, 8], strides = [1, 1]} : vector<8x96xbf16> to vector<8x8xbf16>
    %77 = vector.extract_strided_slice %33 {offsets = [0, 72], sizes = [8, 8], strides = [1, 1]} : vector<8x96xbf16> to vector<8x8xbf16>
    %cst_29 = arith.constant -1.000000e+30 : f32
    %78 = vector.broadcast %cst_29 : f32 to vector<8x1xf32>
    %cst_30 = arith.constant 0.000000e+00 : f32
    %79 = vector.broadcast %cst_30 : f32 to vector<8x1xf32>
    %cst_31 = arith.constant 0.000000e+00 : f32
    %80 = vector.broadcast %cst_31 : f32 to vector<8x8xf32>
    %cst_32 = arith.constant dense<0.000000e+00> : vector<8x8xf32>
    %81 = tpu.matmul %75, %76, %cst_32 {dimension_numbers = #tpu.dot_dimension_numbers<[1], [1], [0], [0], [0, 0, 1, 0], [], []>} : vector<8x8xbf16>, vector<8x8xbf16>, vector<8x8xf32> -> vector<8x8xf32>
    %82 = arith.addf %81, %41 : vector<8x8xf32>
    %cst_33 = arith.constant dense<0xFF800000> : vector<8xf32>
    %83 = vector.multi_reduction <maximumf>, %82, %cst_33 [1] : vector<8x8xf32> to vector<8xf32>
    %84 = vector.shape_cast %83 : vector<8xf32> to vector<8x1xf32>
    %85 = arith.maximumf %78, %84 : vector<8x1xf32>
    %86 = arith.subf %78, %85 : vector<8x1xf32>
    %87 = math.exp %86 : vector<8x1xf32>
    %88 = vector.broadcast %85 : vector<8x1xf32> to vector<8x8xf32>
    %89 = arith.subf %82, %88 : vector<8x8xf32>
    %90 = math.exp %89 : vector<8x8xf32>
    %91 = arith.mulf %87, %79 : vector<8x1xf32>
    %cst_34 = arith.constant dense<0.000000e+00> : vector<8xf32>
    %92 = vector.multi_reduction <add>, %90, %cst_34 [1] : vector<8x8xf32> to vector<8xf32>
    %93 = vector.shape_cast %92 : vector<8xf32> to vector<8x1xf32>
    %94 = arith.addf %91, %93 : vector<8x1xf32>
    %95 = vector.broadcast %87 : vector<8x1xf32> to vector<8x8xf32>
    %96 = arith.mulf %95, %80 : vector<8x8xf32>
    %97 = arith.truncf %90 : vector<8x8xf32> to vector<8x8xbf16>
    %cst_35 = arith.constant dense<0.000000e+00> : vector<8x8xf32>
    %98 = tpu.matmul %97, %77, %cst_35 {dimension_numbers = #tpu.dot_dimension_numbers<[1], [0], [0], [1], [0, 0, 1, 1], [], []>} : vector<8x8xbf16>, vector<8x8xbf16>, vector<8x8xf32> -> vector<8x8xf32>
    %99 = arith.addf %96, %98 : vector<8x8xf32>
    %100 = tpu.reciprocal %94 {approx = true} : vector<8x1xf32> -> vector<8x1xf32>
    %101 = vector.broadcast %100 : vector<8x1xf32> to vector<8x8xf32>
    %102 = arith.mulf %99, %101 : vector<8x8xf32>
    %103 = arith.truncf %102 : vector<8x8xf32> to vector<8x8xbf16>
    %c8 = arith.constant 8 : index
    %c0_36 = arith.constant 0 : index
    %104 = vector.load %arg3[%c8, %c0_36] : memref<32x32xbf16, #tpu.memory_space<vmem>>, vector<8x32xbf16>
    %cst_37 = arith.constant dense<0.000000e+00> : vector<8x32xf32>
    %105 = tpu.matmul %103, %104, %cst_37 {dimension_numbers = #tpu.dot_dimension_numbers<[1], [0], [0], [1], [0, 0, 1, 1], [], []>} : vector<8x8xbf16>, vector<8x32xbf16>, vector<8x32xf32> -> vector<8x32xf32>
    %106 = arith.addf %74, %105 : vector<8x32xf32>
    %107 = vector.extract_strided_slice %33 {offsets = [0, 16], sizes = [8, 8], strides = [1, 1]} : vector<8x96xbf16> to vector<8x8xbf16>
    %108 = vector.extract_strided_slice %33 {offsets = [0, 48], sizes = [8, 8], strides = [1, 1]} : vector<8x96xbf16> to vector<8x8xbf16>
    %109 = vector.extract_strided_slice %33 {offsets = [0, 80], sizes = [8, 8], strides = [1, 1]} : vector<8x96xbf16> to vector<8x8xbf16>
    %cst_38 = arith.constant -1.000000e+30 : f32
    %110 = vector.broadcast %cst_38 : f32 to vector<8x1xf32>
    %cst_39 = arith.constant 0.000000e+00 : f32
    %111 = vector.broadcast %cst_39 : f32 to vector<8x1xf32>
    %cst_40 = arith.constant 0.000000e+00 : f32
    %112 = vector.broadcast %cst_40 : f32 to vector<8x8xf32>
    %cst_41 = arith.constant dense<0.000000e+00> : vector<8x8xf32>
    %113 = tpu.matmul %107, %108, %cst_41 {dimension_numbers = #tpu.dot_dimension_numbers<[1], [1], [0], [0], [0, 0, 1, 0], [], []>} : vector<8x8xbf16>, vector<8x8xbf16>, vector<8x8xf32> -> vector<8x8xf32>
    %114 = arith.addf %113, %41 : vector<8x8xf32>
    %cst_42 = arith.constant dense<0xFF800000> : vector<8xf32>
    %115 = vector.multi_reduction <maximumf>, %114, %cst_42 [1] : vector<8x8xf32> to vector<8xf32>
    %116 = vector.shape_cast %115 : vector<8xf32> to vector<8x1xf32>
    %117 = arith.maximumf %110, %116 : vector<8x1xf32>
    %118 = arith.subf %110, %117 : vector<8x1xf32>
    %119 = math.exp %118 : vector<8x1xf32>
    %120 = vector.broadcast %117 : vector<8x1xf32> to vector<8x8xf32>
    %121 = arith.subf %114, %120 : vector<8x8xf32>
    %122 = math.exp %121 : vector<8x8xf32>
    %123 = arith.mulf %119, %111 : vector<8x1xf32>
    %cst_43 = arith.constant dense<0.000000e+00> : vector<8xf32>
    %124 = vector.multi_reduction <add>, %122, %cst_43 [1] : vector<8x8xf32> to vector<8xf32>
    %125 = vector.shape_cast %124 : vector<8xf32> to vector<8x1xf32>
    %126 = arith.addf %123, %125 : vector<8x1xf32>
    %127 = vector.broadcast %119 : vector<8x1xf32> to vector<8x8xf32>
    %128 = arith.mulf %127, %112 : vector<8x8xf32>
    %129 = arith.truncf %122 : vector<8x8xf32> to vector<8x8xbf16>
    %cst_44 = arith.constant dense<0.000000e+00> : vector<8x8xf32>
    %130 = tpu.matmul %129, %109, %cst_44 {dimension_numbers = #tpu.dot_dimension_numbers<[1], [0], [0], [1], [0, 0, 1, 1], [], []>} : vector<8x8xbf16>, vector<8x8xbf16>, vector<8x8xf32> -> vector<8x8xf32>
    %131 = arith.addf %128, %130 : vector<8x8xf32>
    %132 = tpu.reciprocal %126 {approx = true} : vector<8x1xf32> -> vector<8x1xf32>
    %133 = vector.broadcast %132 : vector<8x1xf32> to vector<8x8xf32>
    %134 = arith.mulf %131, %133 : vector<8x8xf32>
    %135 = arith.truncf %134 : vector<8x8xf32> to vector<8x8xbf16>
    %c16 = arith.constant 16 : index
    %c0_45 = arith.constant 0 : index
    %136 = vector.load %arg3[%c16, %c0_45] : memref<32x32xbf16, #tpu.memory_space<vmem>>, vector<8x32xbf16>
    %cst_46 = arith.constant dense<0.000000e+00> : vector<8x32xf32>
    %137 = tpu.matmul %135, %136, %cst_46 {dimension_numbers = #tpu.dot_dimension_numbers<[1], [0], [0], [1], [0, 0, 1, 1], [], []>} : vector<8x8xbf16>, vector<8x32xbf16>, vector<8x32xf32> -> vector<8x32xf32>
    %138 = arith.addf %106, %137 : vector<8x32xf32>
    %139 = vector.extract_strided_slice %33 {offsets = [0, 24], sizes = [8, 8], strides = [1, 1]} : vector<8x96xbf16> to vector<8x8xbf16>
    %140 = vector.extract_strided_slice %33 {offsets = [0, 56], sizes = [8, 8], strides = [1, 1]} : vector<8x96xbf16> to vector<8x8xbf16>
    %141 = vector.extract_strided_slice %33 {offsets = [0, 88], sizes = [8, 8], strides = [1, 1]} : vector<8x96xbf16> to vector<8x8xbf16>
    %cst_47 = arith.constant -1.000000e+30 : f32
    %142 = vector.broadcast %cst_47 : f32 to vector<8x1xf32>
    %cst_48 = arith.constant 0.000000e+00 : f32
    %143 = vector.broadcast %cst_48 : f32 to vector<8x1xf32>
    %cst_49 = arith.constant 0.000000e+00 : f32
    %144 = vector.broadcast %cst_49 : f32 to vector<8x8xf32>
    %cst_50 = arith.constant dense<0.000000e+00> : vector<8x8xf32>
    %145 = tpu.matmul %139, %140, %cst_50 {dimension_numbers = #tpu.dot_dimension_numbers<[1], [1], [0], [0], [0, 0, 1, 0], [], []>} : vector<8x8xbf16>, vector<8x8xbf16>, vector<8x8xf32> -> vector<8x8xf32>
    %146 = arith.addf %145, %41 : vector<8x8xf32>
    %cst_51 = arith.constant dense<0xFF800000> : vector<8xf32>
    %147 = vector.multi_reduction <maximumf>, %146, %cst_51 [1] : vector<8x8xf32> to vector<8xf32>
    %148 = vector.shape_cast %147 : vector<8xf32> to vector<8x1xf32>
    %149 = arith.maximumf %142, %148 : vector<8x1xf32>
    %150 = arith.subf %142, %149 : vector<8x1xf32>
    %151 = math.exp %150 : vector<8x1xf32>
    %152 = vector.broadcast %149 : vector<8x1xf32> to vector<8x8xf32>
    %153 = arith.subf %146, %152 : vector<8x8xf32>
    %154 = math.exp %153 : vector<8x8xf32>
    %155 = arith.mulf %151, %143 : vector<8x1xf32>
    %cst_52 = arith.constant dense<0.000000e+00> : vector<8xf32>
    %156 = vector.multi_reduction <add>, %154, %cst_52 [1] : vector<8x8xf32> to vector<8xf32>
    %157 = vector.shape_cast %156 : vector<8xf32> to vector<8x1xf32>
    %158 = arith.addf %155, %157 : vector<8x1xf32>
    %159 = vector.broadcast %151 : vector<8x1xf32> to vector<8x8xf32>
    %160 = arith.mulf %159, %144 : vector<8x8xf32>
    %161 = arith.truncf %154 : vector<8x8xf32> to vector<8x8xbf16>
    %cst_53 = arith.constant dense<0.000000e+00> : vector<8x8xf32>
    %162 = tpu.matmul %161, %141, %cst_53 {dimension_numbers = #tpu.dot_dimension_numbers<[1], [0], [0], [1], [0, 0, 1, 1], [], []>} : vector<8x8xbf16>, vector<8x8xbf16>, vector<8x8xf32> -> vector<8x8xf32>
    %163 = arith.addf %160, %162 : vector<8x8xf32>
    %164 = tpu.reciprocal %158 {approx = true} : vector<8x1xf32> -> vector<8x1xf32>
    %165 = vector.broadcast %164 : vector<8x1xf32> to vector<8x8xf32>
    %166 = arith.mulf %163, %165 : vector<8x8xf32>
    %167 = arith.truncf %166 : vector<8x8xf32> to vector<8x8xbf16>
    %c24 = arith.constant 24 : index
    %c0_54 = arith.constant 0 : index
    %168 = vector.load %arg3[%c24, %c0_54] : memref<32x32xbf16, #tpu.memory_space<vmem>>, vector<8x32xbf16>
    %cst_55 = arith.constant dense<0.000000e+00> : vector<8x32xf32>
    %169 = tpu.matmul %167, %168, %cst_55 {dimension_numbers = #tpu.dot_dimension_numbers<[1], [0], [0], [1], [0, 0, 1, 1], [], []>} : vector<8x8xbf16>, vector<8x32xbf16>, vector<8x32xf32> -> vector<8x32xf32>
    %170 = arith.addf %138, %169 : vector<8x32xf32>
    %171 = arith.addf %7, %170 : vector<8x32xf32>
    %172 = vector.broadcast %4 : vector<1x32xf32> to vector<8x32xf32>
    %173 = arith.addf %171, %172 : vector<8x32xf32>
    %cst_56 = arith.constant dense<0.000000e+00> : vector<8xf32>
    %174 = vector.multi_reduction <add>, %173, %cst_56 [1] : vector<8x32xf32> to vector<8xf32>
    %175 = vector.shape_cast %174 : vector<8xf32> to vector<8x1xf32>
    %cst_57 = arith.constant 3.200000e+01 : f32
    %176 = vector.broadcast %cst_57 : f32 to vector<8x1xf32>
    %177 = arith.divf %175, %176 : vector<8x1xf32>
    %178 = vector.broadcast %177 : vector<8x1xf32> to vector<8x32xf32>
    %179 = arith.subf %173, %178 : vector<8x32xf32>
    %180 = arith.mulf %179, %179 : vector<8x32xf32>
    %cst_58 = arith.constant dense<0.000000e+00> : vector<8xf32>
    %181 = vector.multi_reduction <add>, %180, %cst_58 [1] : vector<8x32xf32> to vector<8xf32>
    %182 = vector.shape_cast %181 : vector<8xf32> to vector<8x1xf32>
    %cst_59 = arith.constant 3.200000e+01 : f32
    %183 = vector.broadcast %cst_59 : f32 to vector<8x1xf32>
    %184 = arith.divf %182, %183 : vector<8x1xf32>
    %185 = vector.broadcast %177 : vector<8x1xf32> to vector<8x32xf32>
    %186 = arith.subf %173, %185 : vector<8x32xf32>
    %cst_60 = arith.constant 9.99999974E-6 : f32
    %187 = vector.broadcast %cst_60 : f32 to vector<8x1xf32>
    %188 = arith.addf %184, %187 : vector<8x1xf32>
    %189 = math.rsqrt %188 : vector<8x1xf32>
    %190 = vector.broadcast %189 : vector<8x1xf32> to vector<8x32xf32>
    %191 = arith.mulf %186, %190 : vector<8x32xf32>
    %192 = vector.broadcast %2 : vector<1x32xf32> to vector<8x32xf32>
    %193 = arith.mulf %191, %192 : vector<8x32xf32>
    %194 = vector.broadcast %3 : vector<1x32xf32> to vector<8x32xf32>
    %195 = arith.addf %193, %194 : vector<8x32xf32>
    %c0_61 = arith.constant 0 : index
    %c0_62 = arith.constant 0 : index
    %196 = vector.load %arg4[%c0_61, %c0_62] : memref<32x128xbf16, #tpu.memory_space<vmem>>, vector<32x128xbf16>
    %197 = arith.truncf %195 : vector<8x32xf32> to vector<8x32xbf16>
    %cst_63 = arith.constant dense<0.000000e+00> : vector<8x128xf32>
    %198 = tpu.matmul %197, %196, %cst_63 {dimension_numbers = #tpu.dot_dimension_numbers<[1], [0], [0], [1], [0, 0, 1, 1], [], []>} : vector<8x32xbf16>, vector<32x128xbf16>, vector<8x128xf32> -> vector<8x128xf32>
    %199 = vector.broadcast %6 : vector<1x128xf32> to vector<8x128xf32>
    %200 = arith.addf %198, %199 : vector<8x128xf32>
    %201 = arith.mulf %200, %200 : vector<8x128xf32>
    %202 = arith.mulf %200, %201 : vector<8x128xf32>
    %cst_64 = arith.constant 4.471500e-02 : f32
    %203 = vector.broadcast %cst_64 : f32 to vector<8x128xf32>
    %204 = arith.mulf %203, %202 : vector<8x128xf32>
    %205 = arith.addf %200, %204 : vector<8x128xf32>
    %cst_65 = arith.constant 0.797884583 : f32
    %206 = vector.broadcast %cst_65 : f32 to vector<8x128xf32>
    %207 = arith.mulf %206, %205 : vector<8x128xf32>
    %208 = math.tanh %207 : vector<8x128xf32>
    %cst_66 = arith.constant 1.000000e+00 : f32
    %209 = vector.broadcast %cst_66 : f32 to vector<8x128xf32>
    %210 = arith.addf %209, %208 : vector<8x128xf32>
    %cst_67 = arith.constant 5.000000e-01 : f32
    %211 = vector.broadcast %cst_67 : f32 to vector<8x128xf32>
    %212 = arith.mulf %211, %210 : vector<8x128xf32>
    %213 = arith.mulf %200, %212 : vector<8x128xf32>
    %c0_68 = arith.constant 0 : index
    %c0_69 = arith.constant 0 : index
    %214 = vector.load %arg5[%c0_68, %c0_69] : memref<128x32xbf16, #tpu.memory_space<vmem>>, vector<128x32xbf16>
    %215 = arith.truncf %213 : vector<8x128xf32> to vector<8x128xbf16>
    %cst_70 = arith.constant dense<0.000000e+00> : vector<8x32xf32>
    %216 = tpu.matmul %215, %214, %cst_70 {dimension_numbers = #tpu.dot_dimension_numbers<[1], [0], [0], [1], [0, 0, 1, 1], [], []>} : vector<8x128xbf16>, vector<128x32xbf16>, vector<8x32xf32> -> vector<8x32xf32>
    %217 = vector.broadcast %5 : vector<1x32xf32> to vector<8x32xf32>
    %218 = arith.addf %216, %217 : vector<8x32xf32>
    %219 = arith.addf %173, %218 : vector<8x32xf32>
    %c0_71 = arith.constant 0 : index
    %c0_72 = arith.constant 0 : index
    %220 = vector.load %arg7[%c0_71, %c0_72] : memref<8x32xf32, #tpu.memory_space<vmem>>, vector<8x32xf32>
    tpu.vector_store %arg7[%c0_71, %c0_72], %219 {strides = array<i32>} : memref<8x32xf32, #tpu.memory_space<vmem>>, vector<8x32xf32>,
    return
  }
  func.func @transform_0(%arg0: i32) -> (i32, i32) {
    %c0_i32 = arith.constant 0 : i32
    %c0_i32_0 = arith.constant 0 : i32
    return %arg0, %c0_i32 : i32, i32
  }
  func.func @transform_1(%arg0: i32) -> (i32, i32) {
    %c0_i32 = arith.constant 0 : i32
    %c0_i32_0 = arith.constant 0 : i32
    %c0_i32_1 = arith.constant 0 : i32
    return %c0_i32, %c0_i32_0 : i32, i32
  }
  func.func @transform_2(%arg0: i32) -> (i32, i32) {
    %c0_i32 = arith.constant 0 : i32
    %c0_i32_0 = arith.constant 0 : i32
    %c0_i32_1 = arith.constant 0 : i32
    return %c0_i32, %c0_i32_0 : i32, i32
  }
  func.func @transform_3(%arg0: i32) -> (i32, i32) {
    %c0_i32 = arith.constant 0 : i32
    %c0_i32_0 = arith.constant 0 : i32
    %c0_i32_1 = arith.constant 0 : i32
    return %c0_i32, %c0_i32_0 : i32, i32
  }
  func.func @transform_4(%arg0: i32) -> (i32, i32) {
    %c0_i32 = arith.constant 0 : i32
    %c0_i32_0 = arith.constant 0 : i32
    %c0_i32_1 = arith.constant 0 : i32
    return %c0_i32, %c0_i32_0 : i32, i32
  }
  func.func @transform_5(%arg0: i32) -> (i32, i32) {
    %c0_i32 = arith.constant 0 : i32
    %c0_i32_0 = arith.constant 0 : i32
    %c0_i32_1 = arith.constant 0 : i32
    return %c0_i32, %c0_i32_0 : i32, i32
  }
  func.func @transform_6(%arg0: i32) -> (i32, i32) {
    %c0_i32 = arith.constant 0 : i32
    %c0_i32_0 = arith.constant 0 : i32
    return %arg0, %c0_i32 : i32, i32
  }
}

</mosaic_0001>

<bundles_post_ra>
// kernel: tpu_custom_call.1
= control target key start
LH: loop header
LB: loop body
LE: loop exit
PB: predicated region body
PF: predicated region fallthrough
CT: control target
= control target key end

     0   :  { %11 = vsyncpa [#allocation3], 0  ;;  %s1988_s0 = inlined_call_operand.vmem [shape: f32[16,32], index: 0, kind: input, shape index: {}]   ;;  %s1989_s1 = inlined_call_operand.vmem [shape: bf16[32,96], index: 1, kind: input, shape index: {}]   ;;  %s1990_s2 = inlined_call_operand.vmem [shape: bf16[32,32], index: 2, kind: input, shape index: {}]   ;;  %s1991_s3 = inlined_call_operand.vmem [shape: bf16[32,128], index: 3, kind: input, shape index: {}]   ;;  %s1992_s4 = inlined_call_operand.vmem [shape: bf16[128,32], index: 4, kind: input, shape index: {}]   ;;  %s1993_s5 = inlined_call_operand.vmem [shape: f32[7,128], index: 5, kind: input, shape index: {}]   ;;  %s1994_s6 = inlined_call_operand.hbm [shape: f32[16,32], index: 6, kind: output, shape index: {}]  }
   0x1   :  { %13 = vsyncpa [#allocation3 + $0x1], 0  ;;  %s1694_s21 = smov 0   ;;  %s1696_s22 = smov 0  }
   0x2   :  { %s1698_s23 = smov 0   ;;  %s1700_s24 = smov 0  }
   0x3 LB: > { %s1715_s25 = sadd.s32 4294967295, %s1642_s24   ;;  %s1297_s26 = sadd.s32 4294967294, %s1642_s24   ;;  %s1642_s24 = sphi %s1700_s24, %s2000_s24   ;;  %s1638_s23 = sphi %s1698_s23, %s1999_s23   ;;  %s1634_s22 = sphi %s1696_s22, %s1998_s22   ;;  %s1630_s21 = sphi %s1694_s21, %s1997_s21  }
   0x4   : > { %s1719_s27 = sadd.s32 1, %s1642_s24   ;;  %s157_s28 = sadd.s32 1, %s1638_s23 }
   0x5   : > { %s154_s29 = ssub.s32 %s1642_s24, %s1719_s27  ;;  %p167_p0 = scmp.ne.s32.totalorder %s1638_s23, %s1634_s22 }
   0x6   : > { %p155_p1 = scmp.eq.s32.totalorder %s154_s29, 0  ;;  %p168_p2 = scmp.eq.s32.totalorder %s1715_s25, 1 }
   0x7   : > { %p173_p3 = scmp.ne.s32.totalorder %s1634_s22, %s1630_s21  ;;  %p174_p4 = scmp.eq.s32.totalorder %s1297_s26, 1 }
   0x8   : > { %s1730_s30 = scalar_select %p155_p1, %s1638_s23, %s157_s28  }
   0x9   : > { %p1732_p5 = por %p168_p2, %p167_p0  ;;  %p1736_p6 = por %p174_p4, %p173_p3 }
   0xa   : > { %p1300_p7 = scmp.ge.s32.totalorder %s1642_s24, 1  ;;  %p214_p8 = scmp.lt.s32.totalorder %s1642_s24, 3 }
   0xc   : > { %p215_p9 = pnand %p1300_p7, %p214_p8 }
   0xd   : > { %p243_p10 = scmp.lt.s32.totalorder (!%p215_p9), %s1715_s25, 1  ;;  %s1646_s28 = smov (!%p215_p9), 64  }
   0xe   : > { %218 = sbr.rel (%p215_p9) target bundleno = 3445 (0xd75), region = 44  ;;  %s1647_s29 = smov (!%p215_p9), 96  }
   0xf   : > { %s1651_s11 = smov (!%p215_p9), 56   ;;  %s1652_s12 = smov (!%p215_p9), 80  }
  0x10   : > { %s1654_s14 = smov (!%p215_p9), 48   ;;  %s1655_s15 = smov (!%p215_p9), 72  }
  0x11   : > { %s1656_s18 = smov (!%p215_p9), 104   ;;  %s1658_s20 = smov (!%p215_p9), [#allocation2]  }
  0x12   : > { %s1586_s26 = sshll.u32 (!%p215_p9), %s1658_s20, 4  ;;  %s1587_s26 = int_to_ptr.vmem [resolvable:$false] %s1586_s26 }
  0x13   : > { %s244_s9 = scalar_select %p243_p10, %s1715_s25, 1  ;;  %vm256_vm0 = vcmask 261120   ;;  %v1540_v7 = vld [vmem:[%s1989_s1 + $0x8] sm:$0xff]   ;;  %v1644_v8 = vmov 0.0   ;;  %vm1645_vm1 = vmmov 0   ;;  %v1541_v9 = vld [vmem:[%s1989_s1] sm:$0xff]   ;;  %v342_v29 = vlaneseq }
  0x14   : > { %1379 = vmatprep.subr.bf16.mxu1 %v1644_v8  ;;  %1383 = vmatprep.mubr.msk.bf16.mxu1 %vm1645_vm1, %v1644_v8  ;;  %v1303_v14 = vld [vmem:[%s1993_s5] ss:$0 sm:$0xff]  ;;  %v1304_v16 = vld [vmem:[%s1993_s5 + $0x1] ss:$0 sm:$0xff]  ;;  %vm351_vm2 = vcmask 64512   ;;  %vm419_vm3 = vcmask 1043456  }
  0x15   : > { %s1302_s10 = sshll.u32 %s244_s9, 3  ;;  %1380 = vmatpush3.bf16.msra.mxu1 %v1540_v7  ;;  %1405 = vmatprep.subr.bf16.mxu0 %v1644_v8  ;;  %s1648_s9 = smov 88   ;;  %v343_v30 = vshrl.u32 %v342_v29, 7  ;;  %v345_v31 = vand.u32 127, %v342_v29  ;;  %v1650_v32 = vmov -1e+09  }
  0x16   : > { %s246_s13 = scalar_lea.vmem %s1988_s0, %s1302_s10  ;;  %1381 = vmatprep.subr.bf16.mxu1 %v1644_v8  ;;  %1407 = vmatprep.mubr.msk.bf16.mxu0 %vm1645_vm1, %v1644_v8  ;;  %s1649_s10 = smov 120  }
  0x17   : > { %v1747_v0 = vld [vmem:[%s246_s13] sm:$0xff]  ;;  %vm346_vm4 = vcmp.ge.s32.totalorder %v343_v30, %v345_v31  ;;  %s1653_s13 = smov 112  }
  0x18   : > { %v257_v1 = vsel %vm256_vm0, %v1747_v0, 0.0  ;;  %v1790_v33 = vsel %vm346_vm4, 0.0, %v1650_v32 }
  0x19   : > { %258 = vadd.xlane.f32.xlu0 %v257_v1  ;;  %1382 = vmatpush3.bf16.msra.mxu1 %v1541_v9 }
  0x1a   : > { %1387 = vmatprep.subr.bf16.mxu1 %v1644_v8 }
  0xa2   : > { %v259_v2 = vpop.xlane.xlu0 %258 }
  0xa3   : > { %v261_v3 = vmul.f32 0.03125, %v259_v2 }
  0xa5   : > { %v262_v4 = vsub.f32 %v1747_v0, %v261_v3 }
  0xa7   : > { %v263_v5 = vmul.f32 %v262_v4, %v262_v4 }
  0xa9   : > { %v264_v6 = vsel %vm256_vm0, %v263_v5, 0.0 }
  0xaa   : > { %265 = vadd.xlane.f32.xlu0 %v264_v6 }
 0x133   : > { %v266_v10 = vpop.xlane.xlu0 %265 }
 0x134   : > { %v267_v11 = vmul.f32 0.03125, %v266_v10 }
 0x136   : > { %v268_v12 = vadd.f32 1e-05, %v267_v11 }
 0x138   : > { %1552 = vrsqrt.f32 %v268_v12  ;;  %v467_v12 = vld [vmem:[%s1990_s2] sm:$0xf] }
 0x145   : > { %v1553_v13 = vpop.eup %1552 }
 0x146   : > { %v270_v15 = vmul.f32 %v1553_v13, %v262_v4  ;;  %v637_v13 = vsel %vm419_vm3, %v467_v12, 0 }
 0x148   : > { %v275_v17 = vmul.f32 %v1303_v14, %v270_v15  ;;  %v586_v14 = vld [vmem:[%s1990_s2 + $0x4] sm:$0xf] }
 0x149   : > { %v591_v15 = vsel %vm419_vm3, %v586_v14, 0 }
 0x14a   : > { %v280_v18 = vadd.f32 %v1304_v16, %v275_v17 }
 0x14c   : > { %v285_v19 = vpack.c.bf16 %v280_v18, %v280_v18 }
 0x14e   : > { %1384 = vmatmul.mubr.msk.bf16.vlgmr.msra.gmra.mxu1 %vm256_vm0, %v285_v19 }
 0x14f   : > { %1389 = vmatprep.mubr.msk.bf16.mxu1 %vm1645_vm1, %v1644_v8 }
 0x20e   : > { %v335_v20 = vpop.f32.mrf.mxu1 }
 0x20f   : > { %v1776_v21 = vpack.c.bf16 %v335_v20, %v335_v20 }
 0x210   : > { %v1385_v22 = vpop.f32.mrf.mxu1 }
 0x211   : > { %414 = vrot.lane.b32.xlu0 %v1776_v21, %s1646_s28  ;;  %349 = vrot.lane.b32.xlu1 %v1776_v21, %s1647_s29  ;;  %s1657_s29 = smov 40   ;;  %s1588_s28 = scalar_lea.vmem %s1587_s26, 256 }
 0x212   : > { %v338_v23 = vpop.f32.mrf.mxu1 }
 0x214   : > { %v1386_v24 = vpop.f32.mrf.mxu1 }
 0x215   : > { %470 = vrot.lane.b32.xlu0 %v1776_v21, %s1648_s9  ;;  %s240_s9 = sand.u32 1, %s1634_s22  }
 0x219   : > { %468 = vrot.lane.b32.xlu0 %v1776_v21, %s1649_s10  ;;  %s1301_s10 = sshll.u32 %s240_s9, 3 }
 0x283   : > { %v350_v25 = vpop.permute.xlu1 %349  ;;  %v415_v27 = vpop.permute.xlu0 %414 }
 0x284   : > { %v356_v26 = vsel %vm351_vm2, %v350_v25, 0  ;;  %v421_v28 = vsel %vm419_vm3, %v415_v27, 0 }
 0x285   : > { %1388 = vmatpush3.bf16.xpose.msra.mxu1 %v356_v26 }
 0x286   : > { %1393 = vmatprep.subr.bf16.mxu1 %v1644_v8 }
 0x287   : > { %v471_v47 = vpop.permute.xlu0 %470 }
 0x288   : > { %v476_v49 = vsel %vm351_vm2, %v471_v47, 0 }
 0x28b   : > { %v469_v50 = vpop.permute.xlu0 %468 }
 0x28c   : > { %1390 = vmatmul.mubr.msk.bf16.vlgmr.msra.gmra.mxu1 %vm351_vm2, %v1776_v21 }
 0x28d   : > { %1394 = vmatpush3.bf16.msra.mxu1 %v421_v28  ;;  %1395 = vmatprep.mubr.msk.bf16.mxu1 %vm1645_vm1, %v1644_v8 }
 0x28e   : > { %1399 = vmatprep.subr.bf16.mxu1 %v1644_v8 }
 0x34c   : > { %v392_v34 = vpop.f32.mrf.mxu1 }
 0x34d   : > { %v393_v35 = vadd.f32 %v392_v34, %v1790_v33 }
 0x34e   : > { %v1391_v36 = vpop.f32.mrf.mxu1 }
 0x34f   : > { %v398_v37 = vsel %vm351_vm2, %v393_v35, -inf }
 0x350   : > { %399 = vmax.xlane.f32.xlu1 %v398_v37  ;;  %v395_v38 = vpop.f32.mrf.mxu1 }
 0x352   : > { %v1392_v39 = vpop.f32.mrf.mxu1 }
 0x361   : > { %534 = vrot.lane.b32.xlu1 %v1776_v21, %s1651_s11 }
 0x3d9   : > { %v400_v40 = vpop.xlane.xlu1 %399 }
 0x3da   : > { %v401_v41 = vmax.f32 %v400_v40, -1e+30 }
 0x3dc   : > { %v405_v42 = vsub.f32 %v393_v35, %v401_v41  ;;  %v402_v51 = vsub.f32 -1e+30, %v401_v41 }
 0x3dd   : > { %v535_v43 = vpop.permute.xlu1 %534 }
 0x3de   : > { %v406_v44 = vmul.f32 1.442695, %v405_v42  ;;  %v540_v45 = vsel %vm419_vm3, %v535_v43, 0  ;;  %v403_v52 = vmul.f32 1.442695, %v402_v51 }
 0x3df   : > { %1406 = vmatpush3.bf16.msra.mxu0 %v540_v45 }
 0x3e0   : > { %1417 = vmatprep.subr.bf16.mxu0 %v1644_v8  ;;  %1554 = vpow2.f32 %v406_v44 }
 0x3e1   : > { %1556 = vpow2.f32 %v403_v52 }
 0x3ed   : > { %v1555_v46 = vpop.eup %1554 }
 0x3ee   : > { %v413_v48 = vpack.c.bf16 %v1555_v46, %v1555_v46  ;;  %v1557_v53 = vpop.eup %1556  ;;  %v409_v11 = vsel %vm351_vm2, %v1555_v46, 0.0 }
 0x3ef   : > { %v408_v54 = vmul.f32 0.0, %v1557_v53 }
 0x3f0   : > { %1396 = vmatmul.mubr.msk.bf16.vlgmr.msra.gmra.mxu1 %vm351_vm2, %v413_v48 }
 0x3f1   : > { %1400 = vmatpush3.bf16.xpose.msra.mxu1 %v476_v49  ;;  %1401 = vmatprep.mubr.msk.bf16.mxu1 %vm1645_vm1, %v1644_v8 }
 0x3f2   : > { %1411 = vmatprep.subr.bf16.mxu1 %v1644_v8 }
 0x3f8   : > { %1402 = vmatmul.mubr.msk.bf16.vlgmr.msra.gmra.mxu1 %vm351_vm2, %v469_v50 }
 0x3f9   : > { %1413 = vmatprep.mubr.msk.bf16.mxu1 %vm1645_vm1, %v1644_v8  ;;  %1412 = vmatpush3.bf16.msra.mxu1 %v591_v15 }
 0x3fa   : > { %1423 = vmatprep.subr.bf16.mxu1 %v1644_v8 }
 0x4b0   : > { %v457_v55 = vpop.f32.mrf.mxu1 }
 0x4b1   : > { %v463_v56 = vadd.f32 %v457_v55, %v408_v54 }
 0x4b2   : > { %v1397_v57 = vpop.f32.mrf.mxu1 }
 0x4b4   : > { %v460_v58 = vpop.f32.mrf.mxu1 }
 0x4b6   : > { %v1398_v59 = vpop.f32.mrf.mxu1 }
 0x4b8   : > { %v512_v60 = vpop.f32.mrf.mxu1 }
 0x4b9   : > { %v513_v61 = vadd.f32 %v512_v60, %v1790_v33 }
 0x4ba   : > { %v1403_v62 = vpop.f32.mrf.mxu1 }
 0x4bb   : > { %v518_v63 = vsel %vm351_vm2, %v513_v61, -inf }
 0x4bc   : > { %519 = vmax.xlane.f32.xlu0 %v518_v63  ;;  %v515_v1 = vpop.f32.mrf.mxu1 }
 0x4be   : > { %v1404_v2 = vpop.f32.mrf.mxu1 }
 0x4d2   : > { %681 = vrot.lane.b32.xlu0 %v1776_v21, %s1652_s12 }
 0x4d6   : > { %679 = vrot.lane.b32.xlu0 %v1776_v21, %s1653_s13  ;;  %s1337_s13 = sshll.u32 %s1715_s25, 7  ;;  %s1225_s25 = scalar_lea.sflag [#allocation3], %s240_s9 }
 0x545   : > { %v520_v3 = vpop.xlane.xlu0 %519 }
 0x546   : > { %v521_v4 = vmax.f32 %v520_v3, -1e+30 }
 0x548   : > { %v525_v5 = vsub.f32 %v513_v61, %v521_v4  ;;  %v522_v19 = vsub.f32 -1e+30, %v521_v4  ;;  %v797_v4 = vld [vmem:[%s1990_s2 + $0x8] sm:$0xf] }
 0x549   : > { %v682_v36 = vpop.permute.xlu0 %681 }
 0x54a   : > { %v526_v6 = vmul.f32 1.442695, %v525_v5  ;;  %v523_v20 = vmul.f32 1.442695, %v522_v19  ;;  %v687_v40 = vsel %vm351_vm2, %v682_v36, 0  ;;  %v802_v5 = vsel %vm419_vm3, %v797_v4, 0 }
 0x54c   : > { %1558 = vpow2.f32 %v526_v6 }
 0x54d   : > { %v680_v41 = vpop.permute.xlu0 %679 }
 0x559   : > { %v1559_v7 = vpop.eup %1558 }
 0x55a   : > { %v529_v9 = vsel %vm351_vm2, %v1559_v7, 0.0  ;;  %v533_v10 = vpack.c.bf16 %v1559_v7, %v1559_v7 }
 0x55b   : > { %530 = vadd.xlane.f32.xlu1 %v529_v9 }
 0x55c   : > { %1408 = vmatmul.mubr.msk.bf16.vlgmr.msra.gmra.mxu0 %vm351_vm2, %v533_v10 }
 0x55d   : > { %1419 = vmatprep.mubr.msk.bf16.mxu0 %vm1645_vm1, %v1644_v8  ;;  %1418 = vmatpush3.bf16.msra.mxu0 %v637_v13 }
 0x55e   : > { %1429 = vmatprep.subr.bf16.mxu0 %v1644_v8 }
 0x55f   : > { %410 = vadd.xlane.f32.xlu1 %v409_v11 }
 0x570   : > { %745 = vrot.lane.b32.xlu1 %v1776_v21, %s1654_s14  ;;  %s242_s14 = scalar_lea.vmem [#allocation2], %s1301_s10 }
 0x574   : > { %847 = vrot.lane.b32.xlu1 %v1776_v21, %s1655_s15  ;;  %s1238_s15 = sshll.u32 %s242_s14, 4  ;;  %s1948_s15 = int_to_ptr.vmem [resolvable:$true] %s1238_s15 }
 0x575   : > { %s1582_s19 = scalar_lea.vmem %s1948_s15, 128  ;;  %p1589_p0 = scmp.lt.s32.totalorder %s1948_s15, %s1587_s26 }
 0x576   : > { %p1583_p11 = scmp.ne.s32.totalorder %s1948_s15, %s1582_s19  ;;  %p1590_p1 = scmp.lt.s32.totalorder %s1588_s28, %s1582_s19 }
 0x578   : > { %845 = vrot.lane.b32.xlu1 %v1776_v21, %s1656_s18  ;;  %s1946_s18 = scalar_lea.hbm %s1994_s6, %s1337_s13  ;;  %p1584_p12 = pnand %p1583_p11, %p1732_p5 }
 0x579   : > { %p1591_p2 = por %p1590_p1, %p1589_p0 }
 0x57a   : > { %p1585_p13 = pneg %p1584_p12 }
 0x57c   : > { %p1592_p3 = pnand %p1591_p2, %p1585_p13 }
 0x5e4   : > { %v531_v16 = vpop.xlane.xlu1 %530 }
 0x5e8   : > { %v411_v17 = vpop.xlane.xlu1 %410 }
 0x5e9   : > { %v412_v18 = vadd.f32 %v411_v17, %v408_v54 }
 0x5eb   : > { %1560 = vrcp.f32 %v412_v18 }
 0x5ec   : > { %v746_v24 = vpop.permute.xlu1 %745  ;;  %1562 = vpow2.f32 %v523_v20 }
 0x5ed   : > { %v751_v26 = vsel %vm419_vm3, %v746_v24, 0 }
 0x5f0   : > { %v848_v62 = vpop.permute.xlu1 %847 }
 0x5f1   : > { %v853_v2 = vsel %vm351_vm2, %v848_v62, 0 }
 0x5f4   : > { %v846_v3 = vpop.permute.xlu1 %845 }
 0x5f8   : > { %v1561_v22 = vpop.eup %1560 }
 0x5f9   : > { %v465_v23 = vmul.f32 %v1561_v22, %v463_v56  ;;  %v1563_v27 = vpop.eup %1562 }
 0x5fa   : > { %v528_v28 = vmul.f32 0.0, %v1563_v27 }
 0x5fb   : > { %v466_v25 = vpack.c.bf16 %v465_v23, %v465_v23 }
 0x5fc   : > { %v532_v29 = vadd.f32 %v531_v16, %v528_v28 }
 0x5fd   : > { %1420 = vmatmul.mubr.msk.bf16.vlgmr.msra.gmra.mxu0 %vm351_vm2, %v466_v25 }
 0x5fe   : > { %1430 = vmatpush3.bf16.msra.mxu0 %v751_v26  ;;  %1431 = vmatprep.mubr.msk.bf16.mxu0 %vm1645_vm1, %v1644_v8  ;;  %1564 = vrcp.f32 %v532_v29 }
 0x5ff   : > { %1441 = vmatprep.subr.bf16.mxu0 %v1644_v8 }
 0x60b   : > { %v1565_v32 = vpop.eup %1564 }
 0x61c   : > { %v576_v30 = vpop.f32.mrf.mxu0 }
 0x61d   : > { %v582_v31 = vadd.f32 %v576_v30, %v528_v28 }
 0x61e   : > { %v1409_v34 = vpop.f32.mrf.mxu0 }
 0x61f   : > { %v584_v35 = vmul.f32 %v1565_v32, %v582_v31 }
 0x620   : > { %v579_v37 = vpop.f32.mrf.mxu0 }
 0x621   : > { %v585_v38 = vpack.c.bf16 %v584_v35, %v584_v35 }
 0x622   : > { %v1410_v39 = vpop.f32.mrf.mxu0 }
 0x623   : > { %1414 = vmatmul.mubr.msk.bf16.vlgmr.msra.gmra.mxu1 %vm351_vm2, %v585_v38 }
 0x624   : > { %1424 = vmatpush3.bf16.xpose.msra.mxu1 %v687_v40  ;;  %1425 = vmatprep.mubr.msk.bf16.mxu1 %vm1645_vm1, %v1644_v8 }
 0x625   : > { %1435 = vmatprep.subr.bf16.mxu1 %v1644_v8 }
 0x62b   : > { %1426 = vmatmul.mubr.msk.bf16.vlgmr.msra.gmra.mxu1 %vm351_vm2, %v680_v41  ;;  %v963_v41 = vld [vmem:[%s1990_s2 + $0xc] sm:$0xf] }
 0x62c   : > { %1437 = vmatprep.mubr.msk.bf16.mxu1 %vm1645_vm1, %v1644_v8  ;;  %1436 = vmatpush3.bf16.msra.mxu1 %v802_v5 }
 0x62d   : > { %1447 = vmatprep.subr.bf16.mxu1 %v1644_v8 }
 0x6bd   : > { %v673_v42 = vpop.f32.mrf.mxu0 }
 0x6bf   : > { %v1421_v43 = vpop.f32.mrf.mxu0 }
 0x6c1   : > { %v676_v44 = vpop.f32.mrf.mxu0 }
 0x6c3   : > { %v1422_v45 = vpop.f32.mrf.mxu0 }
 0x6e3   : > { %v627_v46 = vpop.f32.mrf.mxu1 }
 0x6e4   : > { %v1840_v47 = vadd.f32 %v673_v42, %v627_v46  ;;  %v968_v42 = vsel %vm419_vm3, %v963_v41, 0 }
 0x6e5   : > { %v1415_v48 = vpop.f32.mrf.mxu1 }
 0x6e7   : > { %v630_v49 = vpop.f32.mrf.mxu1 }
 0x6e9   : > { %v1416_v50 = vpop.f32.mrf.mxu1 }
 0x6eb   : > { %v723_v51 = vpop.f32.mrf.mxu1 }
 0x6ec   : > { %v724_v52 = vadd.f32 %v723_v51, %v1790_v33 }
 0x6ed   : > { %v1427_v53 = vpop.f32.mrf.mxu1 }
 0x6ee   : > { %v729_v54 = vsel %vm351_vm2, %v724_v52, -inf }
 0x6ef   : > { %730 = vmax.xlane.f32.xlu0 %v729_v54  ;;  %v726_v55 = vpop.f32.mrf.mxu1 }
 0x6f1   : > { %v1428_v56 = vpop.f32.mrf.mxu1 }
 0x778   : > { %v731_v57 = vpop.xlane.xlu0 %730 }
 0x779   : > { %v732_v58 = vmax.f32 %v731_v57, -1e+30 }
 0x77b   : > { %v736_v59 = vsub.f32 %v724_v52, %v732_v58  ;;  %v733_v6 = vsub.f32 -1e+30, %v732_v58 }
 0x77d   : > { %v737_v60 = vmul.f32 1.442695, %v736_v59  ;;  %v734_v7 = vmul.f32 1.442695, %v733_v6  ;;  %v1320_v59 = vld [vmem:[%s1993_s5 + $0x4] ss:$0 sm:$0xff] }
 0x77f   : > { %1566 = vpow2.f32 %v737_v60 }
 0x780   : > { %1568 = vpow2.f32 %v734_v7 }
 0x78c   : > { %v1567_v61 = vpop.eup %1566 }
 0x78d   : > { %v740_v63 = vsel %vm351_vm2, %v1567_v61, 0.0  ;;  %v744_v1 = vpack.c.bf16 %v1567_v61, %v1567_v61  ;;  %v1569_v9 = vpop.eup %1568 }
 0x78e   : > { %741 = vadd.xlane.f32.xlu1 %v740_v63  ;;  %v739_v11 = vmul.f32 0.0, %v1569_v9  ;;  %v1543_v9 = vld [vmem:[%s1991_s3] sm:$0xff]  }
 0x78f   : > { %1432 = vmatmul.mubr.msk.bf16.vlgmr.msra.gmra.mxu0 %vm351_vm2, %v744_v1 }
 0x790   : > { %1442 = vmatpush3.bf16.xpose.msra.mxu0 %v853_v2  ;;  %1443 = vmatprep.mubr.msk.bf16.mxu0 %vm1645_vm1, %v1644_v8 }
 0x791   : > { %1453 = vmatprep.subr.bf16.mxu0 %v1644_v8 }
 0x797   : > { %1444 = vmatmul.mubr.msk.bf16.vlgmr.msra.gmra.mxu0 %vm351_vm2, %v846_v3 }
 0x798   : > { %1455 = vmatprep.mubr.msk.bf16.mxu0 %vm1645_vm1, %v1644_v8  ;;  %1454 = vmatpush3.bf16.msra.mxu0 %v968_v42 }
 0x799   : > { %1467 = vmatprep.subr.bf16.mxu0 %v1644_v8 }
 0x817   : > { %v742_v10 = vpop.xlane.xlu1 %741 }
 0x818   : > { %v743_v12 = vadd.f32 %v742_v10, %v739_v11 }
 0x81a   : > { %1570 = vrcp.f32 %v743_v12 }
 0x827   : > { %v1571_v15 = vpop.eup %1570 }
 0x84f   : > { %v787_v13 = vpop.f32.mrf.mxu0 }
 0x850   : > { %v793_v14 = vadd.f32 %v787_v13, %v739_v11 }
 0x851   : > { %v1433_v16 = vpop.f32.mrf.mxu0 }
 0x852   : > { %v795_v17 = vmul.f32 %v1571_v15, %v793_v14  ;;  %v1321_v14 = vld [vmem:[%s1993_s5 + $0x2] ss:$0 sm:$0xff]  ;;  %v1322_v16 = vld [vmem:[%s1993_s5 + $0x3] ss:$0 sm:$0xff] }
 0x853   : > { %v790_v18 = vpop.f32.mrf.mxu0 }
 0x854   : > { %v796_v19 = vpack.c.bf16 %v795_v17, %v795_v17 }
 0x855   : > { %v1434_v20 = vpop.f32.mrf.mxu0 }
 0x856   : > { %1438 = vmatmul.mubr.msk.bf16.vlgmr.msra.gmra.mxu1 %vm351_vm2, %v796_v19  ;;  %v1544_v20 = vld [vmem:[%s1992_s4 + $0x38] sm:$0xff]  }
 0x857   : > { %v889_v22 = vpop.f32.mrf.mxu0  ;;  %1449 = vmatprep.mubr.msk.bf16.mxu1 %vm1645_vm1, %v1644_v8 }
 0x858   : > { %v890_v23 = vadd.f32 %v889_v22, %v1790_v33  ;;  %v1545_v22 = vld [vmem:[%s1992_s4 + $0x30] sm:$0xff]  }
 0x859   : > { %v1445_v24 = vpop.f32.mrf.mxu0 }
 0x85a   : > { %v895_v25 = vsel %vm351_vm2, %v890_v23, -inf  ;;  %v1547_v24 = vld [vmem:[%s1992_s4 + $0x20] sm:$0xff]  }
 0x85b   : > { %896 = vmax.xlane.f32.xlu0 %v895_v25  ;;  %v892_v26 = vpop.f32.mrf.mxu0  ;;  %v1548_v25 = vld [vmem:[%s1992_s4 + $0x18] sm:$0xff]  }
 0x85c   : > { %v1549_v26 = vld [vmem:[%s1992_s4 + $0x10] sm:$0xff]  }
 0x85d   : > { %v1446_v27 = vpop.f32.mrf.mxu0 }
 0x85e   : > { %v1550_v27 = vld [vmem:[%s1992_s4 + $0x8] sm:$0xff]  }
 0x871   : > { %911 = vrot.lane.b32.xlu0 %v1776_v21, %s1657_s29 }
 0x8e4   : > { %v897_v28 = vpop.xlane.xlu0 %896 }
 0x8e5   : > { %v898_v29 = vmax.f32 %v897_v28, -1e+30  ;;  %v1551_v28 = vld [vmem:[%s1992_s4] sm:$0xff]  }
 0x8e7   : > { %v902_v30 = vsub.f32 %v890_v23, %v898_v29  ;;  %v899_v43 = vsub.f32 -1e+30, %v898_v29  ;;  %v1546_v23 = vld [vmem:[%s1992_s4 + $0x28] sm:$0xff]   ;;  %v1323_v29 = vld [vmem:[%s1993_s5 + $0x6] ss:$0 sm:$0xff] }
 0x8e8   : > { %v912_v31 = vpop.permute.xlu0 %911 }
 0x8e9   : > { %v903_v32 = vmul.f32 1.442695, %v902_v30  ;;  %v917_v34 = vsel %vm419_vm3, %v912_v31, 0  ;;  %v900_v44 = vmul.f32 1.442695, %v899_v43 }
 0x8ea   : > { %1448 = vmatpush3.bf16.msra.mxu1 %v917_v34  ;;  %v1327_v43 = vld [vmem:[%s1993_s5 + $0x5] ss:$0 sm:$0xff] }
 0x8eb   : > { %1459 = vmatprep.subr.bf16.mxu1 %v1644_v8  ;;  %1572 = vpow2.f32 %v903_v32 }
 0x8ec   : > { %1574 = vpow2.f32 %v900_v44 }
 0x8f8   : > { %v1573_v33 = vpop.eup %1572 }
 0x8f9   : > { %v906_v35 = vsel %vm351_vm2, %v1573_v33, 0.0  ;;  %v910_v36 = vpack.c.bf16 %v1573_v33, %v1573_v33  ;;  %v1575_v45 = vpop.eup %1574 }
 0x8fa   : > { %907 = vadd.xlane.f32.xlu0 %v906_v35  ;;  %v905_v48 = vmul.f32 0.0, %v1575_v45 }
 0x8fb   : > { %1450 = vmatmul.mubr.msk.bf16.vlgmr.msra.gmra.mxu1 %vm351_vm2, %v910_v36 }
 0x8fc   : > { %1463 = vmatprep.mubr.msk.bf16.mxu1 %vm1645_vm1, %v1644_v8 }
 0x916   : > { %v838_v21 = vpop.f32.mrf.mxu1 }
 0x917   : > { %v844_v37 = vadd.f32 %v838_v21, %v1840_v47 }
 0x918   : > { %v1439_v38 = vpop.f32.mrf.mxu1 }
 0x91a   : > { %v841_v39 = vpop.f32.mrf.mxu1 }
 0x91c   : > { %v1440_v40 = vpop.f32.mrf.mxu1 }
 0x983   : > { %v908_v46 = vpop.xlane.xlu0 %907 }
 0x984   : > { %v909_v49 = vadd.f32 %v908_v46, %v905_v48 }
 0x986   : > { %1576 = vrcp.f32 %v909_v49 }
 0x993   : > { %v1577_v51 = vpop.eup %1576 }
 0x9bb   : > { %v953_v47 = vpop.f32.mrf.mxu1 }
 0x9bc   : > { %v959_v50 = vadd.f32 %v953_v47, %v905_v48 }
 0x9bd   : > { %v1451_v52 = vpop.f32.mrf.mxu1 }
 0x9be   : > { %v961_v53 = vmul.f32 %v1577_v51, %v959_v50 }
 0x9bf   : > { %v956_v54 = vpop.f32.mrf.mxu1 }
 0x9c0   : > { %v962_v55 = vpack.c.bf16 %v961_v53, %v961_v53 }
 0x9c1   : > { %v1452_v56 = vpop.f32.mrf.mxu1 }
 0x9c2   : > { %1456 = vmatmul.mubr.msk.bf16.vlgmr.msra.gmra.mxu0 %vm351_vm2, %v962_v55 }
 0x9c3   : > { %1483 = vmatprep.mubr.msk.bf16.mxu0 %vm1645_vm1, %v1644_v8  ;;  %1468 = vmatpush3.bf16.msra.mxu0 %v1544_v20 }
 0x9c4   : > { %1469 = vmatprep.subr.bf16.mxu0 %v1644_v8 }
 0x9c7   : > { %1470 = vmatpush3.bf16.msra.mxu0 %v1545_v22 }
 0x9c8   : > { %1471 = vmatprep.subr.bf16.mxu0 %v1644_v8 }
 0x9cb   : > { %1472 = vmatpush3.bf16.msra.mxu0 %v1546_v23 }
 0x9cc   : > { %1473 = vmatprep.subr.bf16.mxu0 %v1644_v8 }
 0x9cf   : > { %1474 = vmatpush3.bf16.msra.mxu0 %v1547_v24 }
 0x9d0   : > { %1475 = vmatprep.subr.bf16.mxu0 %v1644_v8 }
 0x9d3   : > { %1476 = vmatpush3.bf16.msra.mxu0 %v1548_v25 }
 0x9d4   : > { %1477 = vmatprep.subr.bf16.mxu0 %v1644_v8 }
 0x9d7   : > { %1478 = vmatpush3.bf16.msra.mxu0 %v1549_v26 }
 0x9d8   : > { %1479 = vmatprep.subr.bf16.mxu0 %v1644_v8 }
 0x9db   : > { %1480 = vmatpush3.bf16.msra.mxu0 %v1550_v27 }
 0x9dc   : > { %1481 = vmatprep.subr.bf16.mxu0 %v1644_v8 }
 0x9df   : > { %1482 = vmatpush3.bf16.msra.mxu0 %v1551_v28 }
 0xa82   : > { %v1004_v57 = vpop.f32.mrf.mxu0 }
 0xa83   : > { %v1010_v58 = vadd.f32 %v1004_v57, %v844_v37 }
 0xa84   : > { %v1457_v60 = vpop.f32.mrf.mxu0 }
 0xa85   : > { %v1011_v61 = vadd.f32 %v1010_v58, %v1747_v0  ;;  %v1542_v0 = vld [vmem:[%s1991_s3 + $0x8] sm:$0xff]  }
 0xa86   : > { %v1007_v62 = vpop.f32.mrf.mxu0  ;;  %1460 = vmatpush3.bf16.msra.mxu1 %v1542_v0 }
 0xa87   : > { %v1883_v63 = vadd.f32 %v1320_v59, %v1011_v61  ;;  %1461 = vmatprep.subr.bf16.mxu1 %v1644_v8 }
 0xa88   : > { %v1458_v1 = vpop.f32.mrf.mxu0 }
 0xa89   : > { %v1017_v2 = vsel %vm256_vm0, %v1883_v63, 0.0 }
 0xa8a   : > { %1018 = vadd.xlane.f32.xlu1 %v1017_v2  ;;  %1462 = vmatpush3.bf16.msra.mxu1 %v1543_v9 }
 0xb13   : > { %v1019_v3 = vpop.xlane.xlu1 %1018 }
 0xb14   : > { %v1020_v4 = vmul.f32 0.03125, %v1019_v3 }
 0xb16   : > { %v1021_v5 = vsub.f32 %v1883_v63, %v1020_v4 }
 0xb18   : > { %v1022_v6 = vmul.f32 %v1021_v5, %v1021_v5 }
 0xb1a   : > { %v1023_v7 = vsel %vm256_vm0, %v1022_v6, 0.0 }
 0xb1b   : > { %1024 = vadd.xlane.f32.xlu1 %v1023_v7 }
 0xba4   : > { %v1025_v10 = vpop.xlane.xlu1 %1024 }
 0xba5   : > { %v1026_v11 = vmul.f32 0.03125, %v1025_v10 }
 0xba7   : > { %v1027_v12 = vadd.f32 1e-05, %v1026_v11 }
 0xba9   : > { %1578 = vrsqrt.f32 %v1027_v12 }
 0xbb6   : > { %v1579_v13 = vpop.eup %1578 }
 0xbb7   : > { %v1029_v15 = vmul.f32 %v1579_v13, %v1021_v5 }
 0xbb9   : > { %v1034_v17 = vmul.f32 %v1321_v14, %v1029_v15 }
 0xbbb   : > { %v1039_v18 = vadd.f32 %v1322_v16, %v1034_v17 }
 0xbbd   : > { %v1044_v19 = vpack.c.bf16 %v1039_v18, %v1039_v18 }
 0xbbf   : > { %1464 = vmatmul.mubr.msk.bf16.vlgmr.msra.gmra.mxu1 %vm256_vm0, %v1044_v19 }
 0xc7f   : > { %v1098_v30 = vpop.f32.mrf.mxu1 }
 0xc80   : > { %v1099_v31 = vadd.f32 %v1323_v29, %v1098_v30 }
 0xc81   : > { %v1465_v32 = vpop.f32.mrf.mxu1 }
 0xc82   : > { %v1104_v34 = vmul.f32 %v1099_v31, %v1099_v31 }
 0xc83   : > { %v1101_v33 = vpop.f32.mrf.mxu1 }
 0xc84   : > { %v1105_v35 = vmul.f32 %v1104_v34, %v1099_v31 }
 0xc85   : > { %v1466_v36 = vpop.f32.mrf.mxu1 }
 0xc86   : > { %v1106_v21 = vmul.f32 0.044715, %v1105_v35 }
 0xc88   : > { %v1107_v37 = vadd.f32 %v1106_v21, %v1099_v31 }
 0xc8a   : > { %v1108_v38 = vmul.f32 0.7978846, %v1107_v37 }
 0xc8c   : > { %1580 = vtanh.f32 %v1108_v38 }
 0xc99   : > { %v1581_v39 = vpop.eup %1580 }
 0xc9a   : > { %v1110_v8 = vadd.f32 1.0, %v1581_v39 }
 0xc9c   : > { %v1111_v40 = vmul.f32 0.5, %v1110_v8 }
 0xc9e   : > { %v1112_v41 = vmul.f32 %v1111_v40, %v1099_v31 }
 0xca0   : > { %v1129_v42 = vpack.c.bf16 %v1112_v41, %v1112_v41 }
 0xca2   : > { %1484 = vmatmul.mubr.bf16.vlgmr.msra.gmra.mxu0 %v1129_v42 }
 0xd62   : > { %v1216_v44 = vpop.f32.mrf.mxu0 }
 0xd63   : > { %v1217_v45 = vadd.f32 %v1327_v43, %v1216_v44 }
 0xd64   : > { %v1485_v46 = vpop.f32.mrf.mxu0 }
 0xd65   : > { %v1222_v48 = vadd.f32 %v1217_v45, %v1883_v63 }
 0xd66   : > { %v1219_v49 = vpop.f32.mrf.mxu0 }
 0xd67   : > { %1223 = vst.msk [vmem:[%s242_s14] sm:$0xff] %vm256_vm0, %v1222_v48 }
 0xd68   : > { %v1486_v47 = vpop.f32.mrf.mxu0 }
 0xd69   : > { %1595 = shalt.err (!%p1592_p3)
}
 0xd6a   : > { %s1596_s29 = scalar_lea.hbm %s1946_s18, 128  ;;  %s1600_s11 = scalar_lea.hbm %s1994_s6, 256 }
 0xd6b   : > { %p1597_p4 = scmp.ne.s32.totalorder %s1946_s18, %s1596_s29  ;;  %p1601_p9 = scmp.lt.s32.totalorder %s1946_s18, %s1994_s6 }
 0xd6c   : > { %p1602_p10 = scmp.lt.s32.totalorder %s1600_s11, %s1596_s29 }
 0xd6d   : > { %p1598_p7 = pnand %p1597_p4, %p1732_p5 }
 0xd6e   : > { %p1603_p11 = por %p1602_p10, %p1601_p9 }
 0xd6f   : > { %p1599_p8 = pneg %p1598_p7 }
 0xd71   : > { %p1604_p12 = pnand %p1603_p11, %p1599_p8 }
 0xd73   : > { %1607 = shalt.err (!%p1604_p12)
}
 0xd74   : > { %1487 = dma.vmem_to_hbm [thread:$0]  (%p1732_p5), %s1948_s15, 128, %s1946_s18, %s1225_s25  }
 0xd75 PF: > { %p1493_p13 = scmp.ge.s32.totalorder %s1642_s24, 2  ;;  %s1250_s14 = sand.u32 1, %s1630_s21  }
 0xd76   : > { %s1251_s16 = scalar_lea.sflag [#allocation3], %s1250_s14 }
 0xd77   : > { %p1490_p0 = pnand %p1493_p13, %p1736_p6 }
 0xd79   : > { %p1491_p1 = pneg %p1490_p0 }
 0xd7b   : > { %1625 = dma.done.wait (%p1491_p1), %s1251_s16, 128  }
 0xd7c   : > { %1627 = vsyncadd (%p1491_p1), %s1251_s16, 4294967168  ;;  %p16_p2 = scmp.ge.s32.totalorder %s1719_s27, 4   ;;  %s1997_s21 = smov %s1634_s22 }
 0xd7d   : > { %s1998_s22 = smov %s1638_s23  ;;  %s1999_s23 = smov %s1730_s30 }
 0xd7e   : > { %s2000_s24 = smov %s1719_s27  ;;  %18 = sbr.rel (!%p16_p2) target bundleno = 3 (0x3), region = 79 }
 0xd83   :  { %1256 = vsyncpa [#allocation3], 1 }
 0xd84   :  { %1258 = vsyncpa [#allocation3 + $0x1], 1 }

</bundles_post_ra>
